<compile_context>
chip_gen: v6e
topology: v6e:2x2x1
jax: 0.10.0
libtpu: 0.0.40
codegen_flags: <defaults>
</compile_context>

<pallas_src>
import functools

import jax
import jax.numpy as jnp
from jax.experimental import pallas as pl
from jax.experimental.pallas import tpu as pltpu


# Row indices inside the packed parameter slab (each row stored as [1, dim], zero-padded).
_B1, _G1, _BE1, _B2, _G2, _BE2, _B3, _G3, _BE3, _BA = range(10)
_N_ROWS = 10
_LANES = 128


def _round_up(x, m):
    return (x + m - 1) // m * m


def _cdiv(a, b):
    return -(-a // b)


def _layernorm_1pass(x, gamma, beta, inv_n, eps=1e-5):
    # One-pass moments: var = E[x^2] - mean^2 (cheaper than mean -> (x-mean)^2 -> reduce).
    s1 = jnp.sum(x, axis=-1, keepdims=True)
    s2 = jnp.sum(x * x, axis=-1, keepdims=True)
    mu = s1 * inv_n
    var = jnp.maximum(s2 * inv_n - mu * mu, 0.0)
    return (x - mu) * jax.lax.rsqrt(var + eps) * gamma + beta


def critic_fc_kernel(xa_ref, w1_ref, w2_ref, w3_ref, wa_ref, wq_ref,
                     p_ref, bq_ref, out_ref, *, fc1, fc2, fc3):
    # Fused, lane-dense input tile: [TB, lanes] = state | action | zero pad.
    xa = xa_ref[...]

    # fc1 -> LayerNorm -> ReLU.  w1 is zero-padded over the action/pad rows, so the
    # fused tile feeds the MXU directly (K = lane width, no in-kernel column slicing).
    h = jnp.dot(xa, w1_ref[...], preferred_element_type=jnp.float32) + p_ref[_B1:_B1 + 1, :fc1]
    h = _layernorm_1pass(h, p_ref[_G1:_G1 + 1, :fc1], p_ref[_BE1:_BE1 + 1, :fc1], 1.0 / fc1)
    h = jnp.maximum(h, 0.0)

    # fc2 -> LayerNorm -> ReLU
    h = jnp.dot(h, w2_ref[...], preferred_element_type=jnp.float32) + p_ref[_B2:_B2 + 1, :fc2]
    h = _layernorm_1pass(h, p_ref[_G2:_G2 + 1, :fc2], p_ref[_BE2:_BE2 + 1, :fc2], 1.0 / fc2)
    h = jnp.maximum(h, 0.0)

    # fc3 -> LayerNorm   (no ReLU here, matches the PyTorch forward)
    h = jnp.dot(h, w3_ref[...], preferred_element_type=jnp.float32) + p_ref[_B3:_B3 + 1, :fc3]
    h = _layernorm_1pass(h, p_ref[_G3:_G3 + 1, :fc3], p_ref[_BE3:_BE3 + 1, :fc3], 1.0 / fc3)

    # action branch: Linear -> ReLU  (wa zero-padded over the state/pad rows).
    a = jnp.dot(xa, wa_ref[...], preferred_element_type=jnp.float32) + p_ref[_BA:_BA + 1, :fc3]
    a = jnp.maximum(a, 0.0)

    # add -> ReLU -> q head on the (otherwise idle) MXU.
    sa = jnp.maximum(h + a, 0.0)
    q = jnp.dot(sa, wq_ref[...], preferred_element_type=jnp.float32) + bq_ref[0]
    out_ref[...] = q.astype(out_ref.dtype)


def critic_forward(state, action, params, *, block_b=2048):
    """state: [B, input_size], action: [B, n_actions] -> q: [B, 1]"""
    B, input_size = state.shape
    n_actions = action.shape[1]
    fc1 = params["w1"].shape[1]
    fc2 = params["w2"].shape[1]
    fc3 = params["w3"].shape[1]
    pdim = max(fc1, fc2, fc3)

    fused_w = input_size + n_actions
    lanes = _round_up(fused_w, _LANES)

    # One lane-dense input stream: [B, lanes] = state | action | 0-pad.
    xa = jnp.concatenate(
        [state.astype(jnp.float32), action.astype(jnp.float32)], axis=1)
    if lanes != fused_w:
        xa = jnp.pad(xa, ((0, 0), (0, lanes - fused_w)))

    # Zero-pad the first-layer and action-branch weights to the fused lane width so the
    # kernel never slices the input (padded rows multiply the zero/foreign columns -> 0).
    w1p = jnp.zeros((lanes, fc1), jnp.float32).at[:input_size, :].set(
        params["w1"].astype(jnp.float32))
    wap = jnp.zeros((lanes, fc3), jnp.float32).at[input_size:fused_w, :].set(
        params["wa"].astype(jnp.float32))

    def row(v, width):
        v = v.reshape(1, -1).astype(jnp.float32)
        pad = width - v.shape[1]
        return jnp.pad(v, ((0, 0), (0, pad))) if pad else v

    # Pack the 10 small per-feature vectors into one slab (one resident DMA).
    pslab = jnp.concatenate([
        row(params["b1"], pdim), row(params["g1"], pdim), row(params["be1"], pdim),
        row(params["b2"], pdim), row(params["g2"], pdim), row(params["be2"], pdim),
        row(params["b3"], pdim), row(params["g3"], pdim), row(params["be3"], pdim),
        row(params["ba"], pdim),
    ], axis=0)
    wq = params["wq"].reshape(fc3, 1).astype(jnp.float32)
    bq = params["bq"].reshape(-1).astype(jnp.float32)      # (1,) scalar -> SMEM

    # Batch tiling: derive the tile from the tile count so padding stays < 8 rows/tile,
    # and force >= 2 tiles on large batches so v7x megacore has something to shard.
    block_b = _round_up(max(block_b, 8), 8)
    min_tiles = 2 if B >= 256 else 1
    n_tiles = max(_cdiv(B, block_b), min_tiles)
    TB = _round_up(_cdiv(B, n_tiles), 8)
    n_tiles = _cdiv(B, TB)
    Bp = n_tiles * TB
    if Bp != B:
        xa = jnp.pad(xa, ((0, Bp - B), (0, 0)))

    kernel = functools.partial(critic_fc_kernel, fc1=fc1, fc2=fc2, fc3=fc3)

    out = pl.pallas_call(
        kernel,
        out_shape=jax.ShapeDtypeStruct((Bp, 1), jnp.float32),
        grid=(n_tiles,),
        in_specs=[
            pl.BlockSpec((TB, lanes), lambda i: (i, 0)),        # fused state|action tile
            pl.BlockSpec((lanes, fc1), lambda i: (0, 0)),       # resident weights
            pl.BlockSpec((fc1, fc2), lambda i: (0, 0)),
            pl.BlockSpec((fc2, fc3), lambda i: (0, 0)),
            pl.BlockSpec((lanes, fc3), lambda i: (0, 0)),
            pl.BlockSpec((fc3, 1), lambda i: (0, 0)),           # q-head weight column
            pl.BlockSpec((_N_ROWS, pdim), lambda i: (0, 0)),    # packed bias / LN slab
            pl.BlockSpec(memory_space=pltpu.MemorySpace.SMEM),  # q-head bias scalar
        ],
        out_specs=pl.BlockSpec((TB, 1), lambda i: (i, 0)),
        compiler_params=pltpu.CompilerParams(
            dimension_semantics=("parallel",),   # lets v7x split the grid over its 2 TCs
            vmem_limit_bytes=32 << 20,           # fits TB<=2048 double-buffered tiles, v7x-safe
        ),
    )(xa, w1p, params["w2"].astype(jnp.float32), params["w3"].astype(jnp.float32),
      wap, wq, pslab, bq)

    return out[:B]


def init_params(key, n_actions, fc1_dims, fc2_dims, fc3_dims):
    """Deterministic init mirroring the PyTorch module's __init__ (synthetic weights)."""
    input_size = (n_actions - 1) * 7 + n_actions
    keys = jax.random.split(key, 12)

    def unif(k, shape, bound):
        return jax.random.uniform(k, shape, jnp.float32, -bound, bound)

    f1 = 1.0 / jnp.sqrt(input_size)
    f2 = 1.0 / jnp.sqrt(fc1_dims)
    f3 = 1.0 / jnp.sqrt(fc2_dims)
    fa = 1.0 / jnp.sqrt(n_actions)
    f4 = 3e-4

    params = {
        # weights stored [in, out]
        "w1": unif(keys[0], (input_size, fc1_dims), f1),
        "b1": unif(keys[1], (1, fc1_dims), f1),
        "g1": jnp.ones((1, fc1_dims), jnp.float32),
        "be1": jnp.zeros((1, fc1_dims), jnp.float32),
        "w2": unif(keys[2], (fc1_dims, fc2_dims), f2),
        "b2": unif(keys[3], (1, fc2_dims), f2),
        "g2": jnp.ones((1, fc2_dims), jnp.float32),
        "be2": jnp.zeros((1, fc2_dims), jnp.float32),
        "w3": unif(keys[4], (fc2_dims, fc3_dims), f3),
        "b3": unif(keys[5], (1, fc3_dims), f3),
        "g3": jnp.ones((1, fc3_dims), jnp.float32),
        "be3": jnp.zeros((1, fc3_dims), jnp.float32),
        "wa": unif(keys[6], (n_actions, fc3_dims), fa),
        "ba": unif(keys[7], (1, fc3_dims), fa),
        "wq": unif(keys[8], (fc3_dims, 1), f4),
        "bq": unif(keys[9], (1, 1), f4),
    }
    return params, input_size


def reference_forward(state, action, p):
    def ln(x, g, b):
        mu = jnp.mean(x, -1, keepdims=True)
        var = jnp.mean((x - mu) ** 2, -1, keepdims=True)
        return (x - mu) / jnp.sqrt(var + 1e-5) * g + b

    h = jax.nn.relu(ln(state @ p["w1"] + p["b1"], p["g1"], p["be1"]))
    h = jax.nn.relu(ln(h @ p["w2"] + p["b2"], p["g2"], p["be2"]))
    h = ln(h @ p["w3"] + p["b3"], p["g3"], p["be3"])
    a = jax.nn.relu(action @ p["wa"] + p["ba"])
    sa = jax.nn.relu(h + a)
    return sa @ p["wq"] + p["bq"]


if __name__ == "__main__":
    n_actions = 4
    fc1_dims = fc2_dims = fc3_dims = 32
    batch = 8

    key = jax.random.PRNGKey(0)
    kp, ks, ka, ks2, ka2 = jax.random.split(key, 5)
    params, input_size = init_params(kp, n_actions, fc1_dims, fc2_dims, fc3_dims)

    state = jax.random.normal(ks, (batch, input_size), jnp.float32)
    action = jax.random.normal(ka, (batch, n_actions), jnp.float32)

    q = critic_forward(state, action, params)
    jax.block_until_ready(q)
    q_ref = reference_forward(state, action, params)
    assert q.shape == (batch, 1)
    assert jnp.allclose(q, q_ref, atol=1e-5, rtol=1e-5)

    # Exercise the multi-tile grid + batch-padding path (B not a tile multiple).
    batch2 = 20
    state2 = jax.random.normal(ks2, (batch2, input_size), jnp.float32)
    action2 = jax.random.normal(ka2, (batch2, n_actions), jnp.float32)
    q2 = critic_forward(state2, action2, params, block_b=8)
    jax.block_until_ready(q2)
    q2_ref = reference_forward(state2, action2, params)
    assert q2.shape == (batch2, 1)
    assert jnp.allclose(q2, q2_ref, atol=1e-5, rtol=1e-5)

    print("KERNEL_OK")
</pallas_src>

<mosaic_0001>
module attributes {stable_mosaic.version = 11 : i64} {
  func.func @critic_fc_kernel(%arg0: i32, %arg1: memref<8x128xf32, #tpu.memory_space<vmem>>, %arg2: memref<128x32xf32, #tpu.memory_space<vmem>>, %arg3: memref<32x32xf32, #tpu.memory_space<vmem>>, %arg4: memref<32x32xf32, #tpu.memory_space<vmem>>, %arg5: memref<128x32xf32, #tpu.memory_space<vmem>>, %arg6: memref<32x1xf32, #tpu.memory_space<vmem>>, %arg7: memref<10x32xf32, #tpu.memory_space<vmem>>, %arg8: memref<1xf32, #tpu.memory_space<smem>>, %arg9: memref<8x1xf32, #tpu.memory_space<vmem>>) attributes {dimension_semantics = [#tpu.dimension_semantics<parallel>], iteration_bounds = array<i64: 1>, scalar_prefetch = 0 : i64, scratch_operands = 0 : i64, tpu.core_type = #tpu.core_type<tc>, window_params = [{transform_indices = @transform_0, window_bounds = array<i64: 8, 128>}, {pipeline_mode = #tpu.pipeline_mode<synchronous>, transform_indices = @transform_1, window_bounds = array<i64: 128, 32>}, {pipeline_mode = #tpu.pipeline_mode<synchronous>, transform_indices = @transform_2, window_bounds = array<i64: 32, 32>}, {pipeline_mode = #tpu.pipeline_mode<synchronous>, transform_indices = @transform_3, window_bounds = array<i64: 32, 32>}, {pipeline_mode = #tpu.pipeline_mode<synchronous>, transform_indices = @transform_4, window_bounds = array<i64: 128, 32>}, {pipeline_mode = #tpu.pipeline_mode<synchronous>, transform_indices = @transform_5, window_bounds = array<i64: 32, 1>}, {pipeline_mode = #tpu.pipeline_mode<synchronous>, transform_indices = @transform_6, window_bounds = array<i64: 10, 32>}, {transform_indices = @transform_7, window_bounds = array<i64: 1>}, {transform_indices = @transform_8, window_bounds = array<i64: 8, 1>}]} {
    %c0 = arith.constant 0 : index
    %c0_0 = arith.constant 0 : index
    %0 = vector.load %arg1[%c0, %c0_0] : memref<8x128xf32, #tpu.memory_space<vmem>>, vector<8x128xf32>
    %c0_1 = arith.constant 0 : index
    %c0_2 = arith.constant 0 : index
    %1 = vector.load %arg2[%c0_1, %c0_2] : memref<128x32xf32, #tpu.memory_space<vmem>>, vector<128x32xf32>
    %cst = arith.constant dense<0.000000e+00> : vector<8x32xf32>
    %2 = tpu.matmul %0, %1, %cst {dimension_numbers = #tpu.dot_dimension_numbers<[1], [0], [0], [1], [0, 0, 1, 1], [], []>} : vector<8x128xf32>, vector<128x32xf32>, vector<8x32xf32> -> vector<8x32xf32>
    %c0_3 = arith.constant 0 : index
    %c0_4 = arith.constant 0 : index
    %3 = vector.load %arg7[%c0_3, %c0_4] : memref<10x32xf32, #tpu.memory_space<vmem>>, vector<1x32xf32>
    %4 = vector.broadcast %3 : vector<1x32xf32> to vector<8x32xf32>
    %5 = arith.addf %2, %4 : vector<8x32xf32>
    %c1 = arith.constant 1 : index
    %c0_5 = arith.constant 0 : index
    %6 = vector.load %arg7[%c1, %c0_5] : memref<10x32xf32, #tpu.memory_space<vmem>>, vector<1x32xf32>
    %c2 = arith.constant 2 : index
    %c0_6 = arith.constant 0 : index
    %7 = vector.load %arg7[%c2, %c0_6] : memref<10x32xf32, #tpu.memory_space<vmem>>, vector<1x32xf32>
    %cst_7 = arith.constant dense<0.000000e+00> : vector<8xf32>
    %8 = vector.multi_reduction <add>, %5, %cst_7 [1] : vector<8x32xf32> to vector<8xf32>
    %9 = vector.shape_cast %8 : vector<8xf32> to vector<8x1xf32>
    %10 = arith.mulf %5, %5 : vector<8x32xf32>
    %cst_8 = arith.constant dense<0.000000e+00> : vector<8xf32>
    %11 = vector.multi_reduction <add>, %10, %cst_8 [1] : vector<8x32xf32> to vector<8xf32>
    %12 = vector.shape_cast %11 : vector<8xf32> to vector<8x1xf32>
    %cst_9 = arith.constant 3.125000e-02 : f32
    %13 = vector.broadcast %cst_9 : f32 to vector<8x1xf32>
    %14 = arith.mulf %9, %13 : vector<8x1xf32>
    %cst_10 = arith.constant 3.125000e-02 : f32
    %15 = vector.broadcast %cst_10 : f32 to vector<8x1xf32>
    %16 = arith.mulf %12, %15 : vector<8x1xf32>
    %17 = arith.mulf %14, %14 : vector<8x1xf32>
    %18 = arith.subf %16, %17 : vector<8x1xf32>
    %cst_11 = arith.constant 0.000000e+00 : f32
    %19 = vector.broadcast %cst_11 : f32 to vector<8x1xf32>
    %20 = arith.maximumf %18, %19 : vector<8x1xf32>
    %21 = vector.broadcast %14 : vector<8x1xf32> to vector<8x32xf32>
    %22 = arith.subf %5, %21 : vector<8x32xf32>
    %cst_12 = arith.constant 9.99999974E-6 : f32
    %23 = vector.broadcast %cst_12 : f32 to vector<8x1xf32>
    %24 = arith.addf %20, %23 : vector<8x1xf32>
    %25 = math.rsqrt %24 : vector<8x1xf32>
    %26 = vector.broadcast %25 : vector<8x1xf32> to vector<8x32xf32>
    %27 = arith.mulf %22, %26 : vector<8x32xf32>
    %28 = vector.broadcast %6 : vector<1x32xf32> to vector<8x32xf32>
    %29 = arith.mulf %27, %28 : vector<8x32xf32>
    %30 = vector.broadcast %7 : vector<1x32xf32> to vector<8x32xf32>
    %31 = arith.addf %29, %30 : vector<8x32xf32>
    %cst_13 = arith.constant 0.000000e+00 : f32
    %32 = vector.broadcast %cst_13 : f32 to vector<8x32xf32>
    %33 = arith.maximumf %31, %32 : vector<8x32xf32>
    %c0_14 = arith.constant 0 : index
    %c0_15 = arith.constant 0 : index
    %34 = vector.load %arg3[%c0_14, %c0_15] : memref<32x32xf32, #tpu.memory_space<vmem>>, vector<32x32xf32>
    %cst_16 = arith.constant dense<0.000000e+00> : vector<8x32xf32>
    %35 = tpu.matmul %33, %34, %cst_16 {dimension_numbers = #tpu.dot_dimension_numbers<[1], [0], [0], [1], [0, 0, 1, 1], [], []>} : vector<8x32xf32>, vector<32x32xf32>, vector<8x32xf32> -> vector<8x32xf32>
    %c3 = arith.constant 3 : index
    %c0_17 = arith.constant 0 : index
    %36 = vector.load %arg7[%c3, %c0_17] : memref<10x32xf32, #tpu.memory_space<vmem>>, vector<1x32xf32>
    %37 = vector.broadcast %36 : vector<1x32xf32> to vector<8x32xf32>
    %38 = arith.addf %35, %37 : vector<8x32xf32>
    %c4 = arith.constant 4 : index
    %c0_18 = arith.constant 0 : index
    %39 = vector.load %arg7[%c4, %c0_18] : memref<10x32xf32, #tpu.memory_space<vmem>>, vector<1x32xf32>
    %c5 = arith.constant 5 : index
    %c0_19 = arith.constant 0 : index
    %40 = vector.load %arg7[%c5, %c0_19] : memref<10x32xf32, #tpu.memory_space<vmem>>, vector<1x32xf32>
    %cst_20 = arith.constant dense<0.000000e+00> : vector<8xf32>
    %41 = vector.multi_reduction <add>, %38, %cst_20 [1] : vector<8x32xf32> to vector<8xf32>
    %42 = vector.shape_cast %41 : vector<8xf32> to vector<8x1xf32>
    %43 = arith.mulf %38, %38 : vector<8x32xf32>
    %cst_21 = arith.constant dense<0.000000e+00> : vector<8xf32>
    %44 = vector.multi_reduction <add>, %43, %cst_21 [1] : vector<8x32xf32> to vector<8xf32>
    %45 = vector.shape_cast %44 : vector<8xf32> to vector<8x1xf32>
    %cst_22 = arith.constant 3.125000e-02 : f32
    %46 = vector.broadcast %cst_22 : f32 to vector<8x1xf32>
    %47 = arith.mulf %42, %46 : vector<8x1xf32>
    %cst_23 = arith.constant 3.125000e-02 : f32
    %48 = vector.broadcast %cst_23 : f32 to vector<8x1xf32>
    %49 = arith.mulf %45, %48 : vector<8x1xf32>
    %50 = arith.mulf %47, %47 : vector<8x1xf32>
    %51 = arith.subf %49, %50 : vector<8x1xf32>
    %cst_24 = arith.constant 0.000000e+00 : f32
    %52 = vector.broadcast %cst_24 : f32 to vector<8x1xf32>
    %53 = arith.maximumf %51, %52 : vector<8x1xf32>
    %54 = vector.broadcast %47 : vector<8x1xf32> to vector<8x32xf32>
    %55 = arith.subf %38, %54 : vector<8x32xf32>
    %cst_25 = arith.constant 9.99999974E-6 : f32
    %56 = vector.broadcast %cst_25 : f32 to vector<8x1xf32>
    %57 = arith.addf %53, %56 : vector<8x1xf32>
    %58 = math.rsqrt %57 : vector<8x1xf32>
    %59 = vector.broadcast %58 : vector<8x1xf32> to vector<8x32xf32>
    %60 = arith.mulf %55, %59 : vector<8x32xf32>
    %61 = vector.broadcast %39 : vector<1x32xf32> to vector<8x32xf32>
    %62 = arith.mulf %60, %61 : vector<8x32xf32>
    %63 = vector.broadcast %40 : vector<1x32xf32> to vector<8x32xf32>
    %64 = arith.addf %62, %63 : vector<8x32xf32>
    %cst_26 = arith.constant 0.000000e+00 : f32
    %65 = vector.broadcast %cst_26 : f32 to vector<8x32xf32>
    %66 = arith.maximumf %64, %65 : vector<8x32xf32>
    %c0_27 = arith.constant 0 : index
    %c0_28 = arith.constant 0 : index
    %67 = vector.load %arg4[%c0_27, %c0_28] : memref<32x32xf32, #tpu.memory_space<vmem>>, vector<32x32xf32>
    %cst_29 = arith.constant dense<0.000000e+00> : vector<8x32xf32>
    %68 = tpu.matmul %66, %67, %cst_29 {dimension_numbers = #tpu.dot_dimension_numbers<[1], [0], [0], [1], [0, 0, 1, 1], [], []>} : vector<8x32xf32>, vector<32x32xf32>, vector<8x32xf32> -> vector<8x32xf32>
    %c6 = arith.constant 6 : index
    %c0_30 = arith.constant 0 : index
    %69 = vector.load %arg7[%c6, %c0_30] : memref<10x32xf32, #tpu.memory_space<vmem>>, vector<1x32xf32>
    %70 = vector.broadcast %69 : vector<1x32xf32> to vector<8x32xf32>
    %71 = arith.addf %68, %70 : vector<8x32xf32>
    %c7 = arith.constant 7 : index
    %c0_31 = arith.constant 0 : index
    %72 = vector.load %arg7[%c7, %c0_31] : memref<10x32xf32, #tpu.memory_space<vmem>>, vector<1x32xf32>
    %c8 = arith.constant 8 : index
    %c0_32 = arith.constant 0 : index
    %73 = vector.load %arg7[%c8, %c0_32] : memref<10x32xf32, #tpu.memory_space<vmem>>, vector<1x32xf32>
    %cst_33 = arith.constant dense<0.000000e+00> : vector<8xf32>
    %74 = vector.multi_reduction <add>, %71, %cst_33 [1] : vector<8x32xf32> to vector<8xf32>
    %75 = vector.shape_cast %74 : vector<8xf32> to vector<8x1xf32>
    %76 = arith.mulf %71, %71 : vector<8x32xf32>
    %cst_34 = arith.constant dense<0.000000e+00> : vector<8xf32>
    %77 = vector.multi_reduction <add>, %76, %cst_34 [1] : vector<8x32xf32> to vector<8xf32>
    %78 = vector.shape_cast %77 : vector<8xf32> to vector<8x1xf32>
    %cst_35 = arith.constant 3.125000e-02 : f32
    %79 = vector.broadcast %cst_35 : f32 to vector<8x1xf32>
    %80 = arith.mulf %75, %79 : vector<8x1xf32>
    %cst_36 = arith.constant 3.125000e-02 : f32
    %81 = vector.broadcast %cst_36 : f32 to vector<8x1xf32>
    %82 = arith.mulf %78, %81 : vector<8x1xf32>
    %83 = arith.mulf %80, %80 : vector<8x1xf32>
    %84 = arith.subf %82, %83 : vector<8x1xf32>
    %cst_37 = arith.constant 0.000000e+00 : f32
    %85 = vector.broadcast %cst_37 : f32 to vector<8x1xf32>
    %86 = arith.maximumf %84, %85 : vector<8x1xf32>
    %87 = vector.broadcast %80 : vector<8x1xf32> to vector<8x32xf32>
    %88 = arith.subf %71, %87 : vector<8x32xf32>
    %cst_38 = arith.constant 9.99999974E-6 : f32
    %89 = vector.broadcast %cst_38 : f32 to vector<8x1xf32>
    %90 = arith.addf %86, %89 : vector<8x1xf32>
    %91 = math.rsqrt %90 : vector<8x1xf32>
    %92 = vector.broadcast %91 : vector<8x1xf32> to vector<8x32xf32>
    %93 = arith.mulf %88, %92 : vector<8x32xf32>
    %94 = vector.broadcast %72 : vector<1x32xf32> to vector<8x32xf32>
    %95 = arith.mulf %93, %94 : vector<8x32xf32>
    %96 = vector.broadcast %73 : vector<1x32xf32> to vector<8x32xf32>
    %97 = arith.addf %95, %96 : vector<8x32xf32>
    %c0_39 = arith.constant 0 : index
    %c0_40 = arith.constant 0 : index
    %98 = vector.load %arg5[%c0_39, %c0_40] : memref<128x32xf32, #tpu.memory_space<vmem>>, vector<128x32xf32>
    %cst_41 = arith.constant dense<0.000000e+00> : vector<8x32xf32>
    %99 = tpu.matmul %0, %98, %cst_41 {dimension_numbers = #tpu.dot_dimension_numbers<[1], [0], [0], [1], [0, 0, 1, 1], [], []>} : vector<8x128xf32>, vector<128x32xf32>, vector<8x32xf32> -> vector<8x32xf32>
    %c9 = arith.constant 9 : index
    %c0_42 = arith.constant 0 : index
    %100 = vector.load %arg7[%c9, %c0_42] : memref<10x32xf32, #tpu.memory_space<vmem>>, vector<1x32xf32>
    %101 = vector.broadcast %100 : vector<1x32xf32> to vector<8x32xf32>
    %102 = arith.addf %99, %101 : vector<8x32xf32>
    %cst_43 = arith.constant 0.000000e+00 : f32
    %103 = vector.broadcast %cst_43 : f32 to vector<8x32xf32>
    %104 = arith.maximumf %102, %103 : vector<8x32xf32>
    %105 = arith.addf %97, %104 : vector<8x32xf32>
    %cst_44 = arith.constant 0.000000e+00 : f32
    %106 = vector.broadcast %cst_44 : f32 to vector<8x32xf32>
    %107 = arith.maximumf %105, %106 : vector<8x32xf32>
    %c0_45 = arith.constant 0 : index
    %c0_46 = arith.constant 0 : index
    %108 = vector.load %arg6[%c0_45, %c0_46] : memref<32x1xf32, #tpu.memory_space<vmem>>, vector<32x1xf32>
    %cst_47 = arith.constant dense<0.000000e+00> : vector<8x1xf32>
    %109 = tpu.matmul %107, %108, %cst_47 {dimension_numbers = #tpu.dot_dimension_numbers<[1], [0], [0], [1], [0, 0, 1, 1], [], []>} : vector<8x32xf32>, vector<32x1xf32>, vector<8x1xf32> -> vector<8x1xf32>
    %c0_48 = arith.constant 0 : index
    %110 = memref.load %arg8[%c0_48] : memref<1xf32, #tpu.memory_space<smem>>
    %111 = vector.broadcast %110 : f32 to vector<8x1xf32>
    %112 = arith.addf %109, %111 : vector<8x1xf32>
    %c0_49 = arith.constant 0 : index
    %c0_50 = arith.constant 0 : index
    %113 = vector.load %arg9[%c0_49, %c0_50] : memref<8x1xf32, #tpu.memory_space<vmem>>, vector<8x1xf32>
    tpu.vector_store %arg9[%c0_49, %c0_50], %112 {strides = array<i32>} : memref<8x1xf32, #tpu.memory_space<vmem>>, vector<8x1xf32>,
    return
  }
  func.func @transform_0(%arg0: i32) -> (i32, i32) {
    %c0_i32 = arith.constant 0 : i32
    %c0_i32_0 = arith.constant 0 : i32
    return %arg0, %c0_i32 : i32, i32
  }
  func.func @transform_1(%arg0: i32) -> (i32, i32) {
    %c0_i32 = arith.constant 0 : i32
    %c0_i32_0 = arith.constant 0 : i32
    %c0_i32_1 = arith.constant 0 : i32
    return %c0_i32, %c0_i32_0 : i32, i32
  }
  func.func @transform_2(%arg0: i32) -> (i32, i32) {
    %c0_i32 = arith.constant 0 : i32
    %c0_i32_0 = arith.constant 0 : i32
    %c0_i32_1 = arith.constant 0 : i32
    return %c0_i32, %c0_i32_0 : i32, i32
  }
  func.func @transform_3(%arg0: i32) -> (i32, i32) {
    %c0_i32 = arith.constant 0 : i32
    %c0_i32_0 = arith.constant 0 : i32
    %c0_i32_1 = arith.constant 0 : i32
    return %c0_i32, %c0_i32_0 : i32, i32
  }
  func.func @transform_4(%arg0: i32) -> (i32, i32) {
    %c0_i32 = arith.constant 0 : i32
    %c0_i32_0 = arith.constant 0 : i32
    %c0_i32_1 = arith.constant 0 : i32
    return %c0_i32, %c0_i32_0 : i32, i32
  }
  func.func @transform_5(%arg0: i32) -> (i32, i32) {
    %c0_i32 = arith.constant 0 : i32
    %c0_i32_0 = arith.constant 0 : i32
    %c0_i32_1 = arith.constant 0 : i32
    return %c0_i32, %c0_i32_0 : i32, i32
  }
  func.func @transform_6(%arg0: i32) -> (i32, i32) {
    %c0_i32 = arith.constant 0 : i32
    %c0_i32_0 = arith.constant 0 : i32
    %c0_i32_1 = arith.constant 0 : i32
    return %c0_i32, %c0_i32_0 : i32, i32
  }
  func.func @transform_7(%arg0: i32) -> i32 {
    %c0_i32 = arith.constant 0 : i32
    %c0_i32_0 = arith.constant 0 : i32
    return %c0_i32 : i32
  }
  func.func @transform_8(%arg0: i32) -> (i32, i32) {
    %c0_i32 = arith.constant 0 : i32
    %c0_i32_0 = arith.constant 0 : i32
    return %arg0, %c0_i32 : i32, i32
  }
}

</mosaic_0001>

<bundles_post_ra>
// kernel: tpu_custom_call.1
= control target key start
LH: loop header
LB: loop body
LE: loop exit
PB: predicated region body
PF: predicated region fallthrough
CT: control target
= control target key end

     0   :  { %v725_v0 = vmov 0.0   ;;  %vm726_vm0 = vmmov 0   ;;  %vm124_vm1 = vcmask 261120   ;;  %vm546_vm2 = vcmask 7168   ;;  %s1010_s1 = inlined_call_operand.vmem [shape: f32[128,32], index: 1, kind: input, shape index: {}]   ;;  %s1011_s0 = inlined_call_operand.vmem [shape: f32[8,128], index: 0, kind: input, shape index: {}]   ;;  %s1012_s6 = inlined_call_operand.vmem [shape: f32[10,32], index: 6, kind: input, shape index: {}]   ;;  %s1013_s2 = inlined_call_operand.vmem [shape: f32[32,32], index: 2, kind: input, shape index: {}]   ;;  %s1014_s3 = inlined_call_operand.vmem [shape: f32[32,32], index: 3, kind: input, shape index: {}]   ;;  %s1015_s4 = inlined_call_operand.vmem [shape: f32[128,32], index: 4, kind: input, shape index: {}]   ;;  %s1016_s5 = inlined_call_operand.vmem [shape: f32[32,1], index: 5, kind: input, shape index: {}]   ;;  %s1017_s7 = inlined_call_operand.<no memory space> [shape: f32[1], index: 7, kind: input, shape index: {}]   ;;  %s1018_s8 = inlined_call_operand.vmem [shape: f32[8,1], index: 8, kind: output, shape index: {}]  }
   0x1   :  { %614 = vmatprep.subr.mxu0 %v725_v0  ;;  %v46_v1 = vld [vmem:[%s1010_s1 + $0x78] sm:$0xff]  ;;  %v45_v2 = vld [vmem:[%s1010_s1 + $0x70] sm:$0xff]  ;;  %646 = vmatprep.mubr.msk.f32.mxu0 %vm726_vm0, %v725_v0  ;;  %v44_v3 = vld [vmem:[%s1010_s1 + $0x68] sm:$0xff] }
   0x2   :  { %615 = vmatpush3.msra.mxu0 %v46_v1  ;;  %649 = vmatprep.subr.mxu1 %v725_v0  ;;  %v43_v4 = vld [vmem:[%s1010_s1 + $0x60] sm:$0xff]  ;;  %v42_v5 = vld [vmem:[%s1010_s1 + $0x58] sm:$0xff]  ;;  %v41_v6 = vld [vmem:[%s1010_s1 + $0x50] sm:$0xff] }
   0x3   :  { %616 = vmatprep.subr.mxu0 %v725_v0  ;;  %657 = vmatprep.mubr.msk.f32.mxu1 %vm726_vm0, %v725_v0  ;;  %v40_v7 = vld [vmem:[%s1010_s1 + $0x48] sm:$0xff]  ;;  %v39_v8 = vld [vmem:[%s1010_s1 + $0x40] sm:$0xff]  ;;  %v38_v9 = vld [vmem:[%s1010_s1 + $0x38] sm:$0xff] }
   0x4   :  { %617 = vmatpush3.msra.mxu0 %v45_v2  ;;  %v37_v10 = vld [vmem:[%s1010_s1 + $0x30] sm:$0xff]  ;;  %v36_v11 = vld [vmem:[%s1010_s1 + $0x28] sm:$0xff]  ;;  %v35_v12 = vld [vmem:[%s1010_s1 + $0x20] sm:$0xff] }
   0x5   :  { %618 = vmatprep.subr.mxu0 %v725_v0  ;;  %v34_v13 = vld [vmem:[%s1010_s1 + $0x18] sm:$0xff]  ;;  %v33_v14 = vld [vmem:[%s1010_s1 + $0x10] sm:$0xff]  ;;  %v32_v15 = vld [vmem:[%s1010_s1 + $0x8] sm:$0xff] }
   0x6   :  { %619 = vmatpush3.msra.mxu0 %v44_v3  ;;  %v31_v16 = vld [vmem:[%s1010_s1] sm:$0xff]  ;;  %v155_v25 = vld [vmem:[%s1013_s2 + $0x18] sm:$0xff]  ;;  %v154_v26 = vld [vmem:[%s1013_s2 + $0x10] sm:$0xff] }
   0x7   :  { %620 = vmatprep.subr.mxu0 %v725_v0  ;;  %v843_v17 = vld [vmem:[%s1011_s0] sm:$0xff]  ;;  %650 = vmatpush3.msra.mxu1 %v155_v25  ;;  %v153_v27 = vld [vmem:[%s1013_s2 + $0x8] sm:$0xff]  ;;  %v266_v52 = vld [vmem:[%s1014_s3 + $0x18] sm:$0xff] }
   0x8   :  { %621 = vmatpush3.msra.mxu0 %v43_v4  ;;  %v552_v18 = vld [vmem:[%s1012_s6] ss:$0 sm:$0xff]  ;;  %651 = vmatprep.subr.mxu1 %v725_v0  ;;  %v553_v39 = vld [vmem:[%s1012_s6 + $0x1] ss:$0 sm:$0xff]  ;;  %v554_v41 = vld [vmem:[%s1012_s6 + $0x2] ss:$0 sm:$0xff] }
   0x9   :  { %622 = vmatprep.subr.mxu0 %v725_v0  ;;  %652 = vmatpush3.msra.mxu1 %v154_v26  ;;  %v152_v28 = vld [vmem:[%s1013_s2] sm:$0xff]  ;;  %v265_v53 = vld [vmem:[%s1014_s3 + $0x10] sm:$0xff]  ;;  %v264_v54 = vld [vmem:[%s1014_s3 + $0x8] sm:$0xff] }
   0xa   :  { %623 = vmatpush3.msra.mxu0 %v42_v5  ;;  %653 = vmatprep.subr.mxu1 %v725_v0  ;;  %v555_v45 = vld [vmem:[%s1012_s6 + $0x3] ss:$0 sm:$0xff]  ;;  %v557_v3 = vld [vmem:[%s1012_s6 + $0x4] ss:$0 sm:$0xff]  ;;  %v558_v5 = vld [vmem:[%s1012_s6 + $0x5] ss:$0 sm:$0xff] }
   0xb   :  { %624 = vmatprep.subr.mxu0 %v725_v0  ;;  %654 = vmatpush3.msra.mxu1 %v153_v27  ;;  %v263_v55 = vld [vmem:[%s1014_s3] sm:$0xff] }
   0xc   :  { %625 = vmatpush3.msra.mxu0 %v41_v6  ;;  %655 = vmatprep.subr.mxu1 %v725_v0  ;;  %v373_v25 = vld [vmem:[%s1015_s4] sm:$0xff] }
   0xd   :  { %626 = vmatprep.subr.mxu0 %v725_v0  ;;  %656 = vmatpush3.msra.mxu1 %v152_v28  ;;  %v559_v26 = vld [vmem:[%s1012_s6 + $0x6] ss:$0 sm:$0xff] }
   0xe   :  { %627 = vmatpush3.msra.mxu0 %v40_v7  ;;  %660 = vmatprep.subr.mxu1 %v725_v0 }
   0xf   :  { %628 = vmatprep.subr.mxu0 %v725_v0 }
  0x10   :  { %629 = vmatpush3.msra.mxu0 %v39_v8 }
  0x11   :  { %630 = vmatprep.subr.mxu0 %v725_v0 }
  0x12   :  { %631 = vmatpush3.msra.mxu0 %v38_v9  ;;  %v388_v9 = vld [vmem:[%s1015_s4 + $0x78] sm:$0xff] }
  0x13   :  { %632 = vmatprep.subr.mxu0 %v725_v0 }
  0x14   :  { %633 = vmatpush3.msra.mxu0 %v37_v10  ;;  %v387_v10 = vld [vmem:[%s1015_s4 + $0x70] sm:$0xff] }
  0x15   :  { %634 = vmatprep.subr.mxu0 %v725_v0 }
  0x16   :  { %635 = vmatpush3.msra.mxu0 %v36_v11  ;;  %v386_v11 = vld [vmem:[%s1015_s4 + $0x68] sm:$0xff] }
  0x17   :  { %636 = vmatprep.subr.mxu0 %v725_v0 }
  0x18   :  { %637 = vmatpush3.msra.mxu0 %v35_v12  ;;  %v385_v12 = vld [vmem:[%s1015_s4 + $0x60] sm:$0xff] }
  0x19   :  { %638 = vmatprep.subr.mxu0 %v725_v0 }
  0x1a   :  { %639 = vmatpush3.msra.mxu0 %v34_v13  ;;  %v384_v13 = vld [vmem:[%s1015_s4 + $0x58] sm:$0xff] }
  0x1b   :  { %640 = vmatprep.subr.mxu0 %v725_v0 }
  0x1c   :  { %641 = vmatpush3.msra.mxu0 %v33_v14  ;;  %v383_v14 = vld [vmem:[%s1015_s4 + $0x50] sm:$0xff] }
  0x1d   :  { %642 = vmatprep.subr.mxu0 %v725_v0 }
  0x1e   :  { %643 = vmatpush3.msra.mxu0 %v32_v15  ;;  %v382_v15 = vld [vmem:[%s1015_s4 + $0x48] sm:$0xff] }
  0x1f   :  { %644 = vmatprep.subr.mxu0 %v725_v0 }
  0x20   :  { %645 = vmatpush3.msra.mxu0 %v31_v16  ;;  %v381_v16 = vld [vmem:[%s1015_s4 + $0x40] sm:$0xff] }
  0x21   :  { %647 = vmatmul.mubr.f32.vlgmr.msra.gmra.mxu0 %v843_v17  ;;  %706 = vmatprep.subr.mxu0 %v725_v0 }
  0x22   :  { %714 = vmatprep.mubr.msk.f32.mxu0 %vm726_vm0, %v725_v0 }
  0xe1   :  { %v118_v19 = vpop.f32.mrf.mxu0 }
  0xe2   :  { %v119_v20 = vadd.f32 %v552_v18, %v118_v19  ;;  %v380_v18 = vld [vmem:[%s1015_s4 + $0x38] sm:$0xff]  ;;  %v379_v19 = vld [vmem:[%s1015_s4 + $0x30] sm:$0xff] }
  0xe3   :  { %v648_v21 = vpop.f32.mrf.mxu0 }
  0xe4   :  { %v125_v22 = vsel %vm124_vm1, %v119_v20, 0.0  ;;  %v128_v23 = vmul.f32 %v119_v20, %v119_v20  ;;  %v377_v21 = vld [vmem:[%s1015_s4 + $0x20] sm:$0xff] }
  0xe5   :  { %126 = vadd.xlane.f32.xlu0 %v125_v22  ;;  %v376_v22 = vld [vmem:[%s1015_s4 + $0x18] sm:$0xff] }
  0xe6   :  { %v129_v24 = vsel %vm124_vm1, %v128_v23, 0.0  ;;  %v375_v23 = vld [vmem:[%s1015_s4 + $0x10] sm:$0xff] }
  0xe9   :  { %130 = vadd.xlane.f32.xlu0 %v129_v24  ;;  %v374_v24 = vld [vmem:[%s1015_s4 + $0x8] sm:$0xff] }
 0x16e   :  { %v127_v29 = vpop.xlane.xlu0 %126 }
 0x16f   :  { %v132_v30 = vmul.f32 0.03125, %v127_v29 }
 0x171   :  { %v134_v32 = vmul.f32 %v132_v30, %v132_v30  ;;  %v137_v37 = vsub.f32 %v119_v20, %v132_v30  ;;  %v378_v20 = vld [vmem:[%s1015_s4 + $0x28] sm:$0xff] }
 0x172   :  { %v131_v31 = vpop.xlane.xlu0 %130 }
 0x173   :  { %v133_v33 = vmul.f32 0.03125, %v131_v31 }
 0x175   :  { %v135_v34 = vsub.f32 %v133_v33, %v134_v32 }
 0x177   :  { %v136_v35 = vmax.f32 %v135_v34, 0.0 }
 0x179   :  { %v138_v36 = vadd.f32 1e-05, %v136_v35  ;;  %v469_v35 = vld [vmem:[%s1016_s5 + $0x10] sm:$0xff] }
 0x17b   :  { %719 = vrsqrt.f32 %v138_v36  ;;  %v468_v36 = vld [vmem:[%s1016_s5 + $0x8] sm:$0xff] }
 0x188   :  { %v720_v38 = vpop.eup %719 }
 0x189   :  { %v140_v40 = vmul.f32 %v720_v38, %v137_v37  ;;  %v467_v37 = vld [vmem:[%s1016_s5] sm:$0xff] }
 0x18b   :  { %v145_v42 = vmul.f32 %v553_v39, %v140_v40 }
 0x18d   :  { %v150_v43 = vadd.f32 %v554_v41, %v145_v42 }
 0x18f   :  { %v151_v44 = vmax.f32 %v150_v43, 0.0 }
 0x191   :  { %658 = vmatmul.mubr.msk.f32.vlgmr.msra.gmra.mxu1 %vm124_vm1, %v151_v44 }
 0x192   :  { %668 = vmatprep.mubr.msk.f32.mxu1 %vm726_vm0, %v725_v0  ;;  %661 = vmatpush3.msra.mxu1 %v266_v52 }
 0x193   :  { %662 = vmatprep.subr.mxu1 %v725_v0 }
 0x194   :  { %663 = vmatpush3.msra.mxu1 %v265_v53 }
 0x195   :  { %664 = vmatprep.subr.mxu1 %v725_v0 }
 0x196   :  { %665 = vmatpush3.msra.mxu1 %v264_v54 }
 0x197   :  { %666 = vmatprep.subr.mxu1 %v725_v0 }
 0x198   :  { %667 = vmatpush3.msra.mxu1 %v263_v55 }
 0x199   :  { %671 = vmatprep.subr.mxu1 %v725_v0 }
 0x251   :  { %v230_v46 = vpop.f32.mrf.mxu1 }
 0x252   :  { %v231_v47 = vadd.f32 %v555_v45, %v230_v46  ;;  %v563_v46 = vld [vmem:[%s1012_s6 + $0x9] ss:$0 sm:$0xff] }
 0x253   :  { %v659_v48 = vpop.f32.mrf.mxu1 }
 0x254   :  { %v236_v49 = vsel %vm124_vm1, %v231_v47, 0.0  ;;  %v239_v50 = vmul.f32 %v231_v47, %v231_v47 }
 0x255   :  { %237 = vadd.xlane.f32.xlu1 %v236_v49  ;;  %v561_v49 = vld [vmem:[%s1012_s6 + $0x7] ss:$0 sm:$0xff] }
 0x256   :  { %v240_v51 = vsel %vm124_vm1, %v239_v50, 0.0 }
 0x259   :  { %241 = vadd.xlane.f32.xlu1 %v240_v51  ;;  %v562_v51 = vld [vmem:[%s1012_s6 + $0x8] ss:$0 sm:$0xff] }
 0x2de   :  { %v238_v56 = vpop.xlane.xlu1 %237 }
 0x2df   :  { %v243_v57 = vmul.f32 0.03125, %v238_v56 }
 0x2e1   :  { %v245_v59 = vmul.f32 %v243_v57, %v243_v57  ;;  %v248_v1 = vsub.f32 %v231_v47, %v243_v57  ;;  %v472_v57 = vstv %s1017_s7 }
 0x2e2   :  { %v242_v58 = vpop.xlane.xlu1 %241 }
 0x2e3   :  { %v244_v60 = vmul.f32 0.03125, %v242_v58 }
 0x2e5   :  { %v246_v61 = vsub.f32 %v244_v60, %v245_v59 }
 0x2e7   :  { %v247_v62 = vmax.f32 %v246_v61, 0.0 }
 0x2e9   :  { %v249_v63 = vadd.f32 1e-05, %v247_v62 }
 0x2eb   :  { %721 = vrsqrt.f32 %v249_v63 }
 0x2f8   :  { %v722_v2 = vpop.eup %721 }
 0x2f9   :  { %v251_v4 = vmul.f32 %v722_v2, %v248_v1 }
 0x2fb   :  { %v256_v6 = vmul.f32 %v557_v3, %v251_v4 }
 0x2fd   :  { %v261_v7 = vadd.f32 %v558_v5, %v256_v6 }
 0x2ff   :  { %v262_v8 = vmax.f32 %v261_v7, 0.0 }
 0x301   :  { %669 = vmatmul.mubr.msk.f32.vlgmr.msra.gmra.mxu1 %vm124_vm1, %v262_v8 }
 0x302   :  { %672 = vmatpush3.msra.mxu1 %v388_v9  ;;  %703 = vmatprep.mubr.msk.f32.mxu1 %vm726_vm0, %v725_v0 }
 0x303   :  { %673 = vmatprep.subr.mxu1 %v725_v0 }
 0x304   :  { %674 = vmatpush3.msra.mxu1 %v387_v10 }
 0x305   :  { %675 = vmatprep.subr.mxu1 %v725_v0 }
 0x306   :  { %676 = vmatpush3.msra.mxu1 %v386_v11 }
 0x307   :  { %677 = vmatprep.subr.mxu1 %v725_v0 }
 0x308   :  { %678 = vmatpush3.msra.mxu1 %v385_v12 }
 0x309   :  { %679 = vmatprep.subr.mxu1 %v725_v0 }
 0x30a   :  { %680 = vmatpush3.msra.mxu1 %v384_v13 }
 0x30b   :  { %681 = vmatprep.subr.mxu1 %v725_v0 }
 0x30c   :  { %682 = vmatpush3.msra.mxu1 %v383_v14 }
 0x30d   :  { %683 = vmatprep.subr.mxu1 %v725_v0 }
 0x30e   :  { %684 = vmatpush3.msra.mxu1 %v382_v15 }
 0x30f   :  { %685 = vmatprep.subr.mxu1 %v725_v0 }
 0x310   :  { %686 = vmatpush3.msra.mxu1 %v381_v16 }
 0x311   :  { %687 = vmatprep.subr.mxu1 %v725_v0 }
 0x312   :  { %688 = vmatpush3.msra.mxu1 %v380_v18 }
 0x313   :  { %689 = vmatprep.subr.mxu1 %v725_v0 }
 0x314   :  { %690 = vmatpush3.msra.mxu1 %v379_v19 }
 0x315   :  { %691 = vmatprep.subr.mxu1 %v725_v0 }
 0x316   :  { %692 = vmatpush3.msra.mxu1 %v378_v20 }
 0x317   :  { %693 = vmatprep.subr.mxu1 %v725_v0 }
 0x318   :  { %694 = vmatpush3.msra.mxu1 %v377_v21 }
 0x319   :  { %695 = vmatprep.subr.mxu1 %v725_v0 }
 0x31a   :  { %696 = vmatpush3.msra.mxu1 %v376_v22 }
 0x31b   :  { %697 = vmatprep.subr.mxu1 %v725_v0 }
 0x31c   :  { %698 = vmatpush3.msra.mxu1 %v375_v23 }
 0x31d   :  { %699 = vmatprep.subr.mxu1 %v725_v0 }
 0x31e   :  { %700 = vmatpush3.msra.mxu1 %v374_v24 }
 0x31f   :  { %701 = vmatprep.subr.mxu1 %v725_v0 }
 0x320   :  { %702 = vmatpush3.msra.mxu1 %v373_v25 }
 0x321   :  { %704 = vmatmul.mubr.f32.vlgmr.msra.gmra.mxu1 %v843_v17  ;;  %v470_v17 = vld [vmem:[%s1016_s5 + $0x18] sm:$0xff] }
 0x322   :  { %707 = vmatpush3.msra.mxu0 %v470_v17 }
 0x323   :  { %708 = vmatprep.subr.mxu0 %v725_v0 }
 0x324   :  { %709 = vmatpush3.msra.mxu0 %v469_v35 }
 0x325   :  { %710 = vmatprep.subr.mxu0 %v725_v0 }
 0x326   :  { %711 = vmatpush3.msra.mxu0 %v468_v36 }
 0x327   :  { %712 = vmatprep.subr.mxu0 %v725_v0 }
 0x328   :  { %713 = vmatpush3.msra.mxu0 %v467_v37 }
 0x3c1   :  { %v341_v27 = vpop.f32.mrf.mxu1 }
 0x3c2   :  { %v342_v28 = vadd.f32 %v559_v26, %v341_v27 }
 0x3c3   :  { %v670_v29 = vpop.f32.mrf.mxu1 }
 0x3c4   :  { %v347_v30 = vsel %vm124_vm1, %v342_v28, 0.0  ;;  %v350_v31 = vmul.f32 %v342_v28, %v342_v28 }
 0x3c5   :  { %348 = vadd.xlane.f32.xlu0 %v347_v30 }
 0x3c6   :  { %v351_v32 = vsel %vm124_vm1, %v350_v31, 0.0 }
 0x3c7   :  { %352 = vadd.xlane.f32.xlu1 %v351_v32 }
 0x3e1   :  { %v460_v33 = vpop.f32.mrf.mxu1 }
 0x3e2   :  { %v461_v0 = vadd.f32 %v563_v46, %v460_v33 }
 0x3e3   :  { %v705_v34 = vpop.f32.mrf.mxu1 }
 0x3e4   :  { %v464_v53 = vmax.f32 %v461_v0, 0.0 }
 0x44e   :  { %v349_v38 = vpop.xlane.xlu0 %348 }
 0x44f   :  { %v354_v39 = vmul.f32 0.03125, %v349_v38 }
 0x450   :  { %v353_v40 = vpop.xlane.xlu1 %352 }
 0x451   :  { %v356_v41 = vmul.f32 %v354_v39, %v354_v39  ;;  %v355_v42 = vmul.f32 0.03125, %v353_v40  ;;  %v359_v47 = vsub.f32 %v342_v28, %v354_v39 }
 0x453   :  { %v357_v43 = vsub.f32 %v355_v42, %v356_v41 }
 0x455   :  { %v358_v44 = vmax.f32 %v357_v43, 0.0 }
 0x457   :  { %v360_v45 = vadd.f32 1e-05, %v358_v44 }
 0x459   :  { %723 = vrsqrt.f32 %v360_v45 }
 0x466   :  { %v724_v48 = vpop.eup %723 }
 0x467   :  { %v362_v50 = vmul.f32 %v724_v48, %v359_v47 }
 0x469   :  { %v367_v52 = vmul.f32 %v561_v49, %v362_v50 }
 0x46b   :  { %v372_v54 = vadd.f32 %v562_v51, %v367_v52 }
 0x46d   :  { %v465_v55 = vadd.f32 %v464_v53, %v372_v54 }
 0x46f   :  { %v466_v56 = vmax.f32 %v465_v55, 0.0 }
 0x471   :  { %715 = vmatmul.mubr.msk.f32.vlgmr.msra.gmra.mxu0 %vm124_vm1, %v466_v56 }
 0x531   :  { %v542_v58 = vpop.f32.mrf.mxu0 }
 0x532   :  { %v543_v59 = vadd.f32 %v542_v58, %v472_v57 }
 0x533   :  { %v716_v60 = vpop.f32.mrf.mxu0 }
 0x534   :  { %547 = vst.msk [vmem:[%s1018_s8] sm:$0xff] %vm546_vm2, %v543_v59 }

</bundles_post_ra>
